<compile_context>
chip_gen: v7x
topology: tpu7x:2x2x1
jax: 0.10.0
libtpu: 0.0.40
codegen_flags: <defaults>
</compile_context>

<pallas_src>
import functools
from math import sqrt

import jax
import jax.numpy as jnp
import numpy as np
from jax.experimental import pallas as pl
from jax.experimental.pallas import tpu as pltpu


def _erf(x):
    # Abramowitz & Stegun 7.1.26, |err| < 1.5e-7 (exact-erf GELU within f32 tol).
    # TODO(synk): switch to lax.erf / tanh-GELU if Mosaic support & downstream allow.
    a1, a2, a3, a4, a5 = (0.254829592, -0.284496736, 1.421413741,
                          -1.453152027, 1.061405429)
    p = 0.3275911
    sgn = jnp.sign(x)
    ax = jnp.abs(x)
    t = 1.0 / (1.0 + p * ax)
    poly = ((((a5 * t + a4) * t + a3) * t + a2) * t + a1) * t
    return sgn * (1.0 - poly * jnp.exp(-ax * ax))


def _gelu_exact(x):
    return 0.5 * x * (1.0 + _erf(x * 0.7071067811865476))


# --------------------------------------------------------------------------- #
# Stage 1: per-graph fused projection + attention + GCN aggregation + skip,
#          plus partial BatchNorm statistics (sum, sum of squares).
# --------------------------------------------------------------------------- #
def cism_stage1_kernel(x_ref, a_ref, w_ref, bcat_ref, bg_ref,
                       s_ref, psum_ref, psumsq_ref, glob_sc,
                       *, num_heads, head_dim, out_dim):
    x = x_ref[...]            # [N, Din]  bf16
    a = a_ref[...]            # [N, N]    bf16 (normalized adjacency block)

    # Fused projection: [q | k | v | xW_gcn | skip] in one bf16 MXU pass.
    proj = jnp.dot(x, w_ref[...], preferred_element_type=jnp.float32) + bcat_ref[...]

    q = proj[:, 0 * out_dim:1 * out_dim]
    k = proj[:, 1 * out_dim:2 * out_dim]
    v = proj[:, 2 * out_dim:3 * out_dim]
    xw = proj[:, 3 * out_dim:4 * out_dim]       # GCN bias slot in bcat is zero
    x_skip = proj[:, 4 * out_dim:5 * out_dim]

    # ---------------- global branch: multi-head self-attention ----------------
    scale = 1.0 / sqrt(head_dim)
    dn = (((1,), (1,)), ((), ()))               # contract last dims: q @ k^T
    for h in range(num_heads):                  # static, small head count
        c0 = h * head_dim
        qh = q[:, c0:c0 + head_dim]
        kh = k[:, c0:c0 + head_dim]
        vh = v[:, c0:c0 + head_dim]
        sc = jax.lax.dot_general(qh, kh, dn,
                                 preferred_element_type=jnp.float32) * scale
        sc = sc - jnp.max(sc, axis=-1, keepdims=True)
        p = jnp.exp(sc)
        attn = p * pl.reciprocal(jnp.sum(p, axis=-1, keepdims=True), approx=True)
        # direct write of this head's output at its column offset (no concatenate)
        glob_sc[:, c0:c0 + head_dim] = jnp.dot(attn, vh,
                                               preferred_element_type=jnp.float32)

    # ---------------- local branch: GCNConv (per-graph block of A) -------------
    x_local = jnp.dot(a.astype(jnp.float32), xw,
                      preferred_element_type=jnp.float32) + bg_ref[...]

    s = x_skip + x_local + glob_sc[...]
    s_ref[...] = s
    # partial BatchNorm statistics for this graph block
    psum_ref[...] = jnp.sum(s, axis=0, keepdims=True)
    psumsq_ref[...] = jnp.sum(s * s, axis=0, keepdims=True)


# --------------------------------------------------------------------------- #
# Stage 2: finalize BatchNorm statistics (biased variance) + normalize + GELU.
# --------------------------------------------------------------------------- #
def cism_stage2_kernel(s_ref, psum_ref, psumsq_ref, gamma_ref, beta_ref, o_ref,
                       *, total_nodes, eps):
    s = s_ref[...]                                            # [N, Dout] f32
    inv_n = 1.0 / total_nodes
    mean = jnp.sum(psum_ref[...], axis=0) * inv_n             # [1, Dout]
    mean_sq = jnp.sum(psumsq_ref[...], axis=0) * inv_n
    var = mean_sq - mean * mean                               # biased variance
    y = (s - mean) * jax.lax.rsqrt(var + eps) * gamma_ref[...] + beta_ref[...]
    # dropout p = 0.0 -> identity
    o_ref[...] = _gelu_exact(y)


# --------------------------------------------------------------------------- #
# Wrapper
# --------------------------------------------------------------------------- #
def connection_interaction_sensing(x, a_blocks, params, *,
                                   num_graphs, nodes_per_graph, num_heads):
    nn_, din = x.shape
    dout = params["wq"].shape[1]
    head_dim = dout // num_heads
    B, N = num_graphs, nodes_per_graph
    assert nn_ == B * N

    # bf16 at the boundary (halves HBM/VMEM traffic; MXU runs bf16 with f32 acc).
    xb = x.reshape(B, N, din).astype(jnp.bfloat16)
    ab = a_blocks.astype(jnp.bfloat16)
    w_cat = jnp.concatenate(
        [params[kk] for kk in ("wq", "wk", "wv", "wg", "ws")],
        axis=1).astype(jnp.bfloat16)                           # [Din, 5*Dout]
    # GCNConv bias is applied after aggregation -> its slot in the fused bias is 0.
    b_cat = jnp.concatenate(
        [params["bq"], params["bk"], params["bv"],
         jnp.zeros_like(params["bg"]), params["bs"]],
        axis=1).astype(jnp.float32)                            # [1, 5*Dout]

    cparams = pltpu.CompilerParams(
        dimension_semantics=("parallel",),       # megacore sharding on v7x
        vmem_limit_bytes=32 * 1024 * 1024)       # fits v5e/v6e/v7x scoped VMEM

    stage1 = pl.pallas_call(
        functools.partial(cism_stage1_kernel, num_heads=num_heads,
                          head_dim=head_dim, out_dim=dout),
        out_shape=(jax.ShapeDtypeStruct((B, N, dout), jnp.float32),
                   jax.ShapeDtypeStruct((B, 1, dout), jnp.float32),
                   jax.ShapeDtypeStruct((B, 1, dout), jnp.float32)),
        grid_spec=pltpu.PrefetchScalarGridSpec(
            num_scalar_prefetch=0,
            grid=(B,),
            in_specs=[
                pl.BlockSpec((None, N, din), lambda b: (b, 0, 0)),      # x block
                pl.BlockSpec((None, N, N), lambda b: (b, 0, 0)),        # A block
                pl.BlockSpec((din, 5 * dout), lambda b: (0, 0)),        # fused W
                pl.BlockSpec((1, 5 * dout), lambda b: (0, 0)),          # fused b
                pl.BlockSpec((1, dout), lambda b: (0, 0)),              # GCN bias
            ],
            out_specs=[
                pl.BlockSpec((None, N, dout), lambda b: (b, 0, 0)),     # s
                pl.BlockSpec((None, 1, dout), lambda b: (b, 0, 0)),     # partial sum
                pl.BlockSpec((None, 1, dout), lambda b: (b, 0, 0)),     # partial sumsq
            ],
            scratch_shapes=[pltpu.VMEM((N, dout), jnp.float32)]),       # head slab
        compiler_params=cparams,
    )
    s, psum, psumsq = stage1(xb, ab, w_cat, b_cat, params["bg"])

    stage2 = pl.pallas_call(
        functools.partial(cism_stage2_kernel, total_nodes=nn_, eps=1e-5),
        out_shape=jax.ShapeDtypeStruct((B, N, dout), jnp.float32),
        grid_spec=pltpu.PrefetchScalarGridSpec(
            num_scalar_prefetch=0,
            grid=(B,),
            in_specs=[
                pl.BlockSpec((None, N, dout), lambda b: (b, 0, 0)),     # s block
                pl.BlockSpec((B, 1, dout), lambda b: (0, 0, 0)),        # all psum
                pl.BlockSpec((B, 1, dout), lambda b: (0, 0, 0)),        # all psumsq
                pl.BlockSpec((1, dout), lambda b: (0, 0)),              # gamma
                pl.BlockSpec((1, dout), lambda b: (0, 0)),              # beta
            ],
            out_specs=pl.BlockSpec((None, N, dout), lambda b: (b, 0, 0)),
        ),
        compiler_params=cparams,
    )
    out = stage2(s, psum, psumsq, params["gamma"], params["beta"])
    # TODO(synk): pad Dout to a multiple of 128 / emit bf16 output if downstream
    # tolerates, to make the final stores lane-dense.
    return out.reshape(nn_, dout)


# ------- glue: block-diagonal GCN normalized adjacency (PyG gcn_norm) -------- #
def build_gcn_adjacency_blocks(edge_index, edge_weight, num_graphs, nodes_per_graph):
    # Equal-sized, contiguously stored graphs: every edge is intra-graph, so only
    # the B diagonal blocks of the NN x NN adjacency are materialized.
    nn_ = num_graphs * nodes_per_graph
    loop = jnp.arange(nn_, dtype=edge_index.dtype)
    src = jnp.concatenate([edge_index[0], loop])
    dst = jnp.concatenate([edge_index[1], loop])
    w = jnp.concatenate([edge_weight, jnp.ones((nn_,), edge_weight.dtype)])
    deg = jnp.zeros((nn_,), w.dtype).at[dst].add(w)
    dinv = jnp.where(deg > 0, jax.lax.rsqrt(deg), 0.0)
    norm = dinv[src] * w * dinv[dst]
    # out[dst] += norm * (x W)[src]  ->  A_b[dst_local, src_local] = norm
    a = jnp.zeros((num_graphs, nodes_per_graph, nodes_per_graph), w.dtype)
    a = a.at[dst // nodes_per_graph,
             dst % nodes_per_graph,
             src % nodes_per_graph].add(norm)
    # TODO(synk): for large/ragged graphs, replace this dense block build with a
    # scalar-prefetch (CSR) gather/accumulate kernel instead of materializing A.
    return a


# ---------------- pure-JAX reference for validation ---------------- #
def reference(x, a_blocks, params, *, num_graphs, nodes_per_graph, num_heads):
    # Mirrors the kernel's boundary bf16 rounding of x, A and weights; math in f32.
    rb = lambda t: t.astype(jnp.bfloat16).astype(jnp.float32)
    nn_, _ = x.shape
    dout = params["wq"].shape[1]
    hd = dout // num_heads
    B, N = num_graphs, nodes_per_graph
    x = rb(x)
    a = rb(a_blocks)
    wq, wk, wv, wg, ws = (rb(params[kk]) for kk in ("wq", "wk", "wv", "wg", "ws"))
    q = x @ wq + params["bq"]
    k = x @ wk + params["bk"]
    v = x @ wv + params["bv"]

    def split(t):
        return t.reshape(B, N, num_heads, hd).transpose(0, 2, 1, 3)

    qh, kh, vh = split(q), split(k), split(v)
    scores = jnp.einsum("bhnd,bhmd->bhnm", qh, kh) / np.sqrt(hd)
    attn = jax.nn.softmax(scores, axis=-1)
    og = jnp.einsum("bhnm,bhmd->bhnd", attn, vh).transpose(0, 2, 1, 3)
    x_global = og.reshape(nn_, dout)

    xw = (x @ wg).reshape(B, N, dout)
    x_local = jnp.einsum("bij,bjd->bid", a, xw).reshape(nn_, dout) + params["bg"]
    x_skip = x @ ws + params["bs"]

    s = x_skip + x_local + x_global
    mean = s.mean(0, keepdims=True)
    var = ((s - mean) ** 2).mean(0, keepdims=True)
    y = (s - mean) / jnp.sqrt(var + 1e-5) * params["gamma"] + params["beta"]
    return jax.nn.gelu(y, approximate=False)


if __name__ == "__main__":
    B, N, DIN, DOUT, H = 2, 8, 16, 32, 4     # 2 graphs x 8 nodes, 16 -> 32 feats, 4 heads
    NN = B * N
    keys = jax.random.split(jax.random.PRNGKey(0), 10)

    x = jax.random.normal(keys[0], (NN, DIN), jnp.float32)

    # ring graph inside each equal-sized graph, both directions
    srcs, dsts = [], []
    for b in range(B):
        for i in range(N):
            u, w_ = b * N + i, b * N + (i + 1) % N
            srcs += [u, w_]
            dsts += [w_, u]
    edge_index = jnp.array([srcs, dsts], dtype=jnp.int32)
    edge_weight = 0.5 + 0.5 * jax.random.uniform(keys[1], (edge_index.shape[1],),
                                                 jnp.float32)

    def lin_init(kk, din, dout):
        bound = 1.0 / np.sqrt(din)
        w = jax.random.uniform(kk, (din, dout), jnp.float32, -bound, bound)
        bkey = jax.random.fold_in(kk, 1)
        b = jax.random.uniform(bkey, (1, dout), jnp.float32, -bound, bound)
        return w, b

    wq, bq = lin_init(keys[2], DIN, DOUT)
    wk, bk = lin_init(keys[3], DIN, DOUT)
    wv, bv = lin_init(keys[4], DIN, DOUT)
    wg, bg = lin_init(keys[5], DIN, DOUT)   # GCNConv weight + bias
    ws, bs = lin_init(keys[6], DIN, DOUT)   # skip_connection
    gamma = jnp.ones((1, DOUT), jnp.float32)   # BatchNorm default init
    beta = jnp.zeros((1, DOUT), jnp.float32)

    params = dict(wq=wq, bq=bq, wk=wk, bk=bk, wv=wv, bv=bv,
                  wg=wg, bg=bg, ws=ws, bs=bs, gamma=gamma, beta=beta)

    a_blocks = build_gcn_adjacency_blocks(edge_index, edge_weight, B, N)

    out = connection_interaction_sensing(
        x, a_blocks, params, num_graphs=B, nodes_per_graph=N, num_heads=H)
    out = jax.block_until_ready(out)

    ref = reference(x, a_blocks, params,
                    num_graphs=B, nodes_per_graph=N, num_heads=H)
    np.testing.assert_allclose(np.asarray(out), np.asarray(ref),
                               rtol=2e-2, atol=2e-2)

    # TODO(synk): ragged (unequal-size) graphs / to_dense_batch masking and
    # stochastic dropout (p != 0) are handled as glue / identity here.
    print("KERNEL_OK")
</pallas_src>

<mosaic_0001>
module attributes {stable_mosaic.version = 11 : i64} {
  func.func @cism_stage1_kernel(%arg0: i32, %arg1: memref<1x8x16xbf16, #tpu.memory_space<vmem>>, %arg2: memref<1x8x8xbf16, #tpu.memory_space<vmem>>, %arg3: memref<16x160xbf16, #tpu.memory_space<vmem>>, %arg4: memref<1x160xf32, #tpu.memory_space<vmem>>, %arg5: memref<1x32xf32, #tpu.memory_space<vmem>>, %arg6: memref<1x8x32xf32, #tpu.memory_space<vmem>>, %arg7: memref<1x1x32xf32, #tpu.memory_space<vmem>>, %arg8: memref<1x1x32xf32, #tpu.memory_space<vmem>>, %arg9: memref<8x32xf32, #tpu.memory_space<vmem>>) attributes {dimension_semantics = [#tpu.dimension_semantics<parallel>], iteration_bounds = array<i64: 2>, scalar_prefetch = 0 : i64, scratch_operands = 1 : i64, tpu.core_type = #tpu.core_type<tc>, window_params = [{transform_indices = @transform_0, window_bounds = array<i64: 1, 8, 16>}, {transform_indices = @transform_1, window_bounds = array<i64: 1, 8, 8>}, {pipeline_mode = #tpu.pipeline_mode<synchronous>, transform_indices = @transform_2, window_bounds = array<i64: 16, 160>}, {pipeline_mode = #tpu.pipeline_mode<synchronous>, transform_indices = @transform_3, window_bounds = array<i64: 1, 160>}, {pipeline_mode = #tpu.pipeline_mode<synchronous>, transform_indices = @transform_4, window_bounds = array<i64: 1, 32>}, {transform_indices = @transform_5, window_bounds = array<i64: 1, 8, 32>}, {transform_indices = @transform_6, window_bounds = array<i64: 1, 1, 32>}, {transform_indices = @transform_7, window_bounds = array<i64: 1, 1, 32>}]} {
    %c0 = arith.constant 0 : index
    %c0_0 = arith.constant 0 : index
    %c0_1 = arith.constant 0 : index
    %0 = vector.load %arg1[%c0, %c0_0, %c0_1] : memref<1x8x16xbf16, #tpu.memory_space<vmem>>, vector<1x8x16xbf16>
    %1 = vector.shape_cast %0 : vector<1x8x16xbf16> to vector<8x16xbf16>
    %c0_2 = arith.constant 0 : index
    %c0_3 = arith.constant 0 : index
    %c0_4 = arith.constant 0 : index
    %2 = vector.load %arg2[%c0_2, %c0_3, %c0_4] : memref<1x8x8xbf16, #tpu.memory_space<vmem>>, vector<1x8x8xbf16>
    %3 = vector.shape_cast %2 : vector<1x8x8xbf16> to vector<8x8xbf16>
    %c0_5 = arith.constant 0 : index
    %c0_6 = arith.constant 0 : index
    %4 = vector.load %arg3[%c0_5, %c0_6] : memref<16x160xbf16, #tpu.memory_space<vmem>>, vector<16x160xbf16>
    %cst = arith.constant dense<0.000000e+00> : vector<8x160xf32>
    %5 = tpu.matmul %1, %4, %cst {dimension_numbers = #tpu.dot_dimension_numbers<[1], [0], [0], [1], [0, 0, 1, 1], [], []>} : vector<8x16xbf16>, vector<16x160xbf16>, vector<8x160xf32> -> vector<8x160xf32>
    %c0_7 = arith.constant 0 : index
    %c0_8 = arith.constant 0 : index
    %6 = vector.load %arg4[%c0_7, %c0_8] : memref<1x160xf32, #tpu.memory_space<vmem>>, vector<1x160xf32>
    %7 = vector.broadcast %6 : vector<1x160xf32> to vector<8x160xf32>
    %8 = arith.addf %5, %7 : vector<8x160xf32>
    %9 = vector.extract_strided_slice %8 {offsets = [0, 0], sizes = [8, 32], strides = [1, 1]} : vector<8x160xf32> to vector<8x32xf32>
    %10 = vector.extract_strided_slice %8 {offsets = [0, 32], sizes = [8, 32], strides = [1, 1]} : vector<8x160xf32> to vector<8x32xf32>
    %11 = vector.extract_strided_slice %8 {offsets = [0, 64], sizes = [8, 32], strides = [1, 1]} : vector<8x160xf32> to vector<8x32xf32>
    %12 = vector.extract_strided_slice %8 {offsets = [0, 96], sizes = [8, 32], strides = [1, 1]} : vector<8x160xf32> to vector<8x32xf32>
    %13 = vector.extract_strided_slice %8 {offsets = [0, 128], sizes = [8, 32], strides = [1, 1]} : vector<8x160xf32> to vector<8x32xf32>
    %14 = vector.extract_strided_slice %9 {offsets = [0, 0], sizes = [8, 8], strides = [1, 1]} : vector<8x32xf32> to vector<8x8xf32>
    %15 = vector.extract_strided_slice %10 {offsets = [0, 0], sizes = [8, 8], strides = [1, 1]} : vector<8x32xf32> to vector<8x8xf32>
    %16 = vector.extract_strided_slice %11 {offsets = [0, 0], sizes = [8, 8], strides = [1, 1]} : vector<8x32xf32> to vector<8x8xf32>
    %cst_9 = arith.constant dense<0.000000e+00> : vector<8x8xf32>
    %17 = tpu.matmul %14, %15, %cst_9 {dimension_numbers = #tpu.dot_dimension_numbers<[1], [1], [0], [0], [0, 0, 1, 0], [], []>} : vector<8x8xf32>, vector<8x8xf32>, vector<8x8xf32> -> vector<8x8xf32>
    %cst_10 = arith.constant 0.353553385 : f32
    %18 = vector.broadcast %cst_10 : f32 to vector<8x8xf32>
    %19 = arith.mulf %17, %18 : vector<8x8xf32>
    %cst_11 = arith.constant dense<0xFF800000> : vector<8xf32>
    %20 = vector.multi_reduction <maximumf>, %19, %cst_11 [1] : vector<8x8xf32> to vector<8xf32>
    %21 = vector.shape_cast %20 : vector<8xf32> to vector<8x1xf32>
    %22 = vector.broadcast %21 : vector<8x1xf32> to vector<8x8xf32>
    %23 = arith.subf %19, %22 : vector<8x8xf32>
    %24 = math.exp %23 : vector<8x8xf32>
    %cst_12 = arith.constant dense<0.000000e+00> : vector<8xf32>
    %25 = vector.multi_reduction <add>, %24, %cst_12 [1] : vector<8x8xf32> to vector<8xf32>
    %26 = vector.shape_cast %25 : vector<8xf32> to vector<8x1xf32>
    %27 = tpu.reciprocal %26 {approx = true} : vector<8x1xf32> -> vector<8x1xf32>
    %28 = vector.broadcast %27 : vector<8x1xf32> to vector<8x8xf32>
    %29 = arith.mulf %24, %28 : vector<8x8xf32>
    %cst_13 = arith.constant dense<0.000000e+00> : vector<8x8xf32>
    %30 = tpu.matmul %29, %16, %cst_13 {dimension_numbers = #tpu.dot_dimension_numbers<[1], [0], [0], [1], [0, 0, 1, 1], [], []>} : vector<8x8xf32>, vector<8x8xf32>, vector<8x8xf32> -> vector<8x8xf32>
    %c0_14 = arith.constant 0 : index
    %c0_15 = arith.constant 0 : index
    %31 = vector.load %arg9[%c0_14, %c0_15] : memref<8x32xf32, #tpu.memory_space<vmem>>, vector<8x8xf32>
    tpu.vector_store %arg9[%c0_14, %c0_15], %30 {strides = array<i32>} : memref<8x32xf32, #tpu.memory_space<vmem>>, vector<8x8xf32>,
    %32 = vector.extract_strided_slice %9 {offsets = [0, 8], sizes = [8, 8], strides = [1, 1]} : vector<8x32xf32> to vector<8x8xf32>
    %33 = vector.extract_strided_slice %10 {offsets = [0, 8], sizes = [8, 8], strides = [1, 1]} : vector<8x32xf32> to vector<8x8xf32>
    %34 = vector.extract_strided_slice %11 {offsets = [0, 8], sizes = [8, 8], strides = [1, 1]} : vector<8x32xf32> to vector<8x8xf32>
    %cst_16 = arith.constant dense<0.000000e+00> : vector<8x8xf32>
    %35 = tpu.matmul %32, %33, %cst_16 {dimension_numbers = #tpu.dot_dimension_numbers<[1], [1], [0], [0], [0, 0, 1, 0], [], []>} : vector<8x8xf32>, vector<8x8xf32>, vector<8x8xf32> -> vector<8x8xf32>
    %cst_17 = arith.constant 0.353553385 : f32
    %36 = vector.broadcast %cst_17 : f32 to vector<8x8xf32>
    %37 = arith.mulf %35, %36 : vector<8x8xf32>
    %cst_18 = arith.constant dense<0xFF800000> : vector<8xf32>
    %38 = vector.multi_reduction <maximumf>, %37, %cst_18 [1] : vector<8x8xf32> to vector<8xf32>
    %39 = vector.shape_cast %38 : vector<8xf32> to vector<8x1xf32>
    %40 = vector.broadcast %39 : vector<8x1xf32> to vector<8x8xf32>
    %41 = arith.subf %37, %40 : vector<8x8xf32>
    %42 = math.exp %41 : vector<8x8xf32>
    %cst_19 = arith.constant dense<0.000000e+00> : vector<8xf32>
    %43 = vector.multi_reduction <add>, %42, %cst_19 [1] : vector<8x8xf32> to vector<8xf32>
    %44 = vector.shape_cast %43 : vector<8xf32> to vector<8x1xf32>
    %45 = tpu.reciprocal %44 {approx = true} : vector<8x1xf32> -> vector<8x1xf32>
    %46 = vector.broadcast %45 : vector<8x1xf32> to vector<8x8xf32>
    %47 = arith.mulf %42, %46 : vector<8x8xf32>
    %cst_20 = arith.constant dense<0.000000e+00> : vector<8x8xf32>
    %48 = tpu.matmul %47, %34, %cst_20 {dimension_numbers = #tpu.dot_dimension_numbers<[1], [0], [0], [1], [0, 0, 1, 1], [], []>} : vector<8x8xf32>, vector<8x8xf32>, vector<8x8xf32> -> vector<8x8xf32>
    %c0_21 = arith.constant 0 : index
    %c8 = arith.constant 8 : index
    %49 = vector.load %arg9[%c0_21, %c8] : memref<8x32xf32, #tpu.memory_space<vmem>>, vector<8x8xf32>
    tpu.vector_store %arg9[%c0_21, %c8], %48 {strides = array<i32>} : memref<8x32xf32, #tpu.memory_space<vmem>>, vector<8x8xf32>,
    %50 = vector.extract_strided_slice %9 {offsets = [0, 16], sizes = [8, 8], strides = [1, 1]} : vector<8x32xf32> to vector<8x8xf32>
    %51 = vector.extract_strided_slice %10 {offsets = [0, 16], sizes = [8, 8], strides = [1, 1]} : vector<8x32xf32> to vector<8x8xf32>
    %52 = vector.extract_strided_slice %11 {offsets = [0, 16], sizes = [8, 8], strides = [1, 1]} : vector<8x32xf32> to vector<8x8xf32>
    %cst_22 = arith.constant dense<0.000000e+00> : vector<8x8xf32>
    %53 = tpu.matmul %50, %51, %cst_22 {dimension_numbers = #tpu.dot_dimension_numbers<[1], [1], [0], [0], [0, 0, 1, 0], [], []>} : vector<8x8xf32>, vector<8x8xf32>, vector<8x8xf32> -> vector<8x8xf32>
    %cst_23 = arith.constant 0.353553385 : f32
    %54 = vector.broadcast %cst_23 : f32 to vector<8x8xf32>
    %55 = arith.mulf %53, %54 : vector<8x8xf32>
    %cst_24 = arith.constant dense<0xFF800000> : vector<8xf32>
    %56 = vector.multi_reduction <maximumf>, %55, %cst_24 [1] : vector<8x8xf32> to vector<8xf32>
    %57 = vector.shape_cast %56 : vector<8xf32> to vector<8x1xf32>
    %58 = vector.broadcast %57 : vector<8x1xf32> to vector<8x8xf32>
    %59 = arith.subf %55, %58 : vector<8x8xf32>
    %60 = math.exp %59 : vector<8x8xf32>
    %cst_25 = arith.constant dense<0.000000e+00> : vector<8xf32>
    %61 = vector.multi_reduction <add>, %60, %cst_25 [1] : vector<8x8xf32> to vector<8xf32>
    %62 = vector.shape_cast %61 : vector<8xf32> to vector<8x1xf32>
    %63 = tpu.reciprocal %62 {approx = true} : vector<8x1xf32> -> vector<8x1xf32>
    %64 = vector.broadcast %63 : vector<8x1xf32> to vector<8x8xf32>
    %65 = arith.mulf %60, %64 : vector<8x8xf32>
    %cst_26 = arith.constant dense<0.000000e+00> : vector<8x8xf32>
    %66 = tpu.matmul %65, %52, %cst_26 {dimension_numbers = #tpu.dot_dimension_numbers<[1], [0], [0], [1], [0, 0, 1, 1], [], []>} : vector<8x8xf32>, vector<8x8xf32>, vector<8x8xf32> -> vector<8x8xf32>
    %c0_27 = arith.constant 0 : index
    %c16 = arith.constant 16 : index
    %67 = vector.load %arg9[%c0_27, %c16] : memref<8x32xf32, #tpu.memory_space<vmem>>, vector<8x8xf32>
    tpu.vector_store %arg9[%c0_27, %c16], %66 {strides = array<i32>} : memref<8x32xf32, #tpu.memory_space<vmem>>, vector<8x8xf32>,
    %68 = vector.extract_strided_slice %9 {offsets = [0, 24], sizes = [8, 8], strides = [1, 1]} : vector<8x32xf32> to vector<8x8xf32>
    %69 = vector.extract_strided_slice %10 {offsets = [0, 24], sizes = [8, 8], strides = [1, 1]} : vector<8x32xf32> to vector<8x8xf32>
    %70 = vector.extract_strided_slice %11 {offsets = [0, 24], sizes = [8, 8], strides = [1, 1]} : vector<8x32xf32> to vector<8x8xf32>
    %cst_28 = arith.constant dense<0.000000e+00> : vector<8x8xf32>
    %71 = tpu.matmul %68, %69, %cst_28 {dimension_numbers = #tpu.dot_dimension_numbers<[1], [1], [0], [0], [0, 0, 1, 0], [], []>} : vector<8x8xf32>, vector<8x8xf32>, vector<8x8xf32> -> vector<8x8xf32>
    %cst_29 = arith.constant 0.353553385 : f32
    %72 = vector.broadcast %cst_29 : f32 to vector<8x8xf32>
    %73 = arith.mulf %71, %72 : vector<8x8xf32>
    %cst_30 = arith.constant dense<0xFF800000> : vector<8xf32>
    %74 = vector.multi_reduction <maximumf>, %73, %cst_30 [1] : vector<8x8xf32> to vector<8xf32>
    %75 = vector.shape_cast %74 : vector<8xf32> to vector<8x1xf32>
    %76 = vector.broadcast %75 : vector<8x1xf32> to vector<8x8xf32>
    %77 = arith.subf %73, %76 : vector<8x8xf32>
    %78 = math.exp %77 : vector<8x8xf32>
    %cst_31 = arith.constant dense<0.000000e+00> : vector<8xf32>
    %79 = vector.multi_reduction <add>, %78, %cst_31 [1] : vector<8x8xf32> to vector<8xf32>
    %80 = vector.shape_cast %79 : vector<8xf32> to vector<8x1xf32>
    %81 = tpu.reciprocal %80 {approx = true} : vector<8x1xf32> -> vector<8x1xf32>
    %82 = vector.broadcast %81 : vector<8x1xf32> to vector<8x8xf32>
    %83 = arith.mulf %78, %82 : vector<8x8xf32>
    %cst_32 = arith.constant dense<0.000000e+00> : vector<8x8xf32>
    %84 = tpu.matmul %83, %70, %cst_32 {dimension_numbers = #tpu.dot_dimension_numbers<[1], [0], [0], [1], [0, 0, 1, 1], [], []>} : vector<8x8xf32>, vector<8x8xf32>, vector<8x8xf32> -> vector<8x8xf32>
    %c0_33 = arith.constant 0 : index
    %c24 = arith.constant 24 : index
    %85 = vector.load %arg9[%c0_33, %c24] : memref<8x32xf32, #tpu.memory_space<vmem>>, vector<8x8xf32>
    tpu.vector_store %arg9[%c0_33, %c24], %84 {strides = array<i32>} : memref<8x32xf32, #tpu.memory_space<vmem>>, vector<8x8xf32>,
    %86 = arith.extf %3 : vector<8x8xbf16> to vector<8x8xf32>
    %cst_34 = arith.constant dense<0.000000e+00> : vector<8x32xf32>
    %87 = tpu.matmul %86, %12, %cst_34 {dimension_numbers = #tpu.dot_dimension_numbers<[1], [0], [0], [1], [0, 0, 1, 1], [], []>} : vector<8x8xf32>, vector<8x32xf32>, vector<8x32xf32> -> vector<8x32xf32>
    %c0_35 = arith.constant 0 : index
    %c0_36 = arith.constant 0 : index
    %88 = vector.load %arg5[%c0_35, %c0_36] : memref<1x32xf32, #tpu.memory_space<vmem>>, vector<1x32xf32>
    %89 = vector.broadcast %88 : vector<1x32xf32> to vector<8x32xf32>
    %90 = arith.addf %87, %89 : vector<8x32xf32>
    %91 = arith.addf %13, %90 : vector<8x32xf32>
    %c0_37 = arith.constant 0 : index
    %c0_38 = arith.constant 0 : index
    %92 = vector.load %arg9[%c0_37, %c0_38] : memref<8x32xf32, #tpu.memory_space<vmem>>, vector<8x32xf32>
    %93 = arith.addf %91, %92 : vector<8x32xf32>
    %c0_39 = arith.constant 0 : index
    %c0_40 = arith.constant 0 : index
    %c0_41 = arith.constant 0 : index
    %94 = vector.load %arg6[%c0_39, %c0_40, %c0_41] : memref<1x8x32xf32, #tpu.memory_space<vmem>>, vector<1x8x32xf32>
    %95 = vector.shape_cast %94 : vector<1x8x32xf32> to vector<8x32xf32>
    %96 = vector.shape_cast %93 : vector<8x32xf32> to vector<1x8x32xf32>
    tpu.vector_store %arg6[%c0_39, %c0_40, %c0_41], %96 {strides = array<i32>} : memref<1x8x32xf32, #tpu.memory_space<vmem>>, vector<1x8x32xf32>,
    %cst_42 = arith.constant dense<0.000000e+00> : vector<32xf32>
    %97 = vector.multi_reduction <add>, %93, %cst_42 [0] : vector<8x32xf32> to vector<32xf32>
    %98 = vector.shape_cast %97 : vector<32xf32> to vector<1x32xf32>
    %c0_43 = arith.constant 0 : index
    %c0_44 = arith.constant 0 : index
    %c0_45 = arith.constant 0 : index
    %99 = vector.load %arg7[%c0_43, %c0_44, %c0_45] : memref<1x1x32xf32, #tpu.memory_space<vmem>>, vector<1x1x32xf32>
    %100 = vector.shape_cast %99 : vector<1x1x32xf32> to vector<1x32xf32>
    %101 = vector.shape_cast %98 : vector<1x32xf32> to vector<1x1x32xf32>
    tpu.vector_store %arg7[%c0_43, %c0_44, %c0_45], %101 {strides = array<i32>} : memref<1x1x32xf32, #tpu.memory_space<vmem>>, vector<1x1x32xf32>,
    %102 = arith.mulf %93, %93 : vector<8x32xf32>
    %cst_46 = arith.constant dense<0.000000e+00> : vector<32xf32>
    %103 = vector.multi_reduction <add>, %102, %cst_46 [0] : vector<8x32xf32> to vector<32xf32>
    %104 = vector.shape_cast %103 : vector<32xf32> to vector<1x32xf32>
    %c0_47 = arith.constant 0 : index
    %c0_48 = arith.constant 0 : index
    %c0_49 = arith.constant 0 : index
    %105 = vector.load %arg8[%c0_47, %c0_48, %c0_49] : memref<1x1x32xf32, #tpu.memory_space<vmem>>, vector<1x1x32xf32>
    %106 = vector.shape_cast %105 : vector<1x1x32xf32> to vector<1x32xf32>
    %107 = vector.shape_cast %104 : vector<1x32xf32> to vector<1x1x32xf32>
    tpu.vector_store %arg8[%c0_47, %c0_48, %c0_49], %107 {strides = array<i32>} : memref<1x1x32xf32, #tpu.memory_space<vmem>>, vector<1x1x32xf32>,
    return
  }
  func.func @transform_0(%arg0: i32) -> (i32, i32, i32) {
    %c0_i32 = arith.constant 0 : i32
    %c0_i32_0 = arith.constant 0 : i32
    %c0_i32_1 = arith.constant 0 : i32
    return %arg0, %c0_i32, %c0_i32_0 : i32, i32, i32
  }
  func.func @transform_1(%arg0: i32) -> (i32, i32, i32) {
    %c0_i32 = arith.constant 0 : i32
    %c0_i32_0 = arith.constant 0 : i32
    %c0_i32_1 = arith.constant 0 : i32
    return %arg0, %c0_i32, %c0_i32_0 : i32, i32, i32
  }
  func.func @transform_2(%arg0: i32) -> (i32, i32) {
    %c0_i32 = arith.constant 0 : i32
    %c0_i32_0 = arith.constant 0 : i32
    %c0_i32_1 = arith.constant 0 : i32
    return %c0_i32, %c0_i32_0 : i32, i32
  }
  func.func @transform_3(%arg0: i32) -> (i32, i32) {
    %c0_i32 = arith.constant 0 : i32
    %c0_i32_0 = arith.constant 0 : i32
    %c0_i32_1 = arith.constant 0 : i32
    return %c0_i32, %c0_i32_0 : i32, i32
  }
  func.func @transform_4(%arg0: i32) -> (i32, i32) {
    %c0_i32 = arith.constant 0 : i32
    %c0_i32_0 = arith.constant 0 : i32
    %c0_i32_1 = arith.constant 0 : i32
    return %c0_i32, %c0_i32_0 : i32, i32
  }
  func.func @transform_5(%arg0: i32) -> (i32, i32, i32) {
    %c0_i32 = arith.constant 0 : i32
    %c0_i32_0 = arith.constant 0 : i32
    %c0_i32_1 = arith.constant 0 : i32
    return %arg0, %c0_i32, %c0_i32_0 : i32, i32, i32
  }
  func.func @transform_6(%arg0: i32) -> (i32, i32, i32) {
    %c0_i32 = arith.constant 0 : i32
    %c0_i32_0 = arith.constant 0 : i32
    %c0_i32_1 = arith.constant 0 : i32
    return %arg0, %c0_i32, %c0_i32_0 : i32, i32, i32
  }
  func.func @transform_7(%arg0: i32) -> (i32, i32, i32) {
    %c0_i32 = arith.constant 0 : i32
    %c0_i32_0 = arith.constant 0 : i32
    %c0_i32_1 = arith.constant 0 : i32
    return %arg0, %c0_i32, %c0_i32_0 : i32, i32, i32
  }
}

</mosaic_0001>

<bundles_post_ra>
// kernel: tpu_custom_call.1
= control target key start
LH: loop header
LB: loop body
LE: loop exit
PB: predicated region body
PF: predicated region fallthrough
CT: control target
= control target key end

     0   :  { %s2321_s0 = inlined_call_operand.hbm [shape: bf16[2,8,16], index: 0, kind: input, shape index: {}]   ;;  %s2322_s1 = inlined_call_operand.hbm [shape: bf16[2,8,8], index: 1, kind: input, shape index: {}]   ;;  %s2323_s2 = inlined_call_operand.hbm [shape: bf16[16,160], index: 2, kind: input, shape index: {}]   ;;  %s2324_s3 = inlined_call_operand.vmem [shape: f32[1,160], index: 3, kind: input, shape index: {}]   ;;  %s2325_s4 = inlined_call_operand.vmem [shape: f32[1,32], index: 4, kind: input, shape index: {}]   ;;  %s2326_s5 = inlined_call_operand.hbm [shape: f32[2,8,32], index: 5, kind: output, shape index: {0}]   ;;  %s2327_s6 = inlined_call_operand.hbm [shape: f32[2,1,32], index: 6, kind: output, shape index: {1}]   ;;  %s2328_s7 = inlined_call_operand.hbm [shape: f32[2,1,32], index: 7, kind: output, shape index: {2}]  }
   0x1   :  { %2337 = sst [smem:[#allocation21_spill]] %s2323_s2 }
   0x2   :  { %13 = vsyncpa [#allocation4], 0 }
   0x3   :  { %15 = vsyncpa [#allocation4 + $0x1], 0 }
   0x4   :  { %16 = vsyncpa [#allocation7], 0 }
   0x5   :  { %18 = vsyncpa [#allocation7 + $0x1], 0 }
   0x6   :  { %19 = vsyncpa [#allocation5], 0 }
   0x7   :  { %21 = vsyncpa [#allocation5 + $0x1], 0 }
   0x8   :  { %22 = vsyncpa [#allocation11], 0 }
   0x9   :  { %24 = vsyncpa [#allocation11 + $0x1], 0  ;;  %s1926_s24 = smov 0   ;;  %s1928_s25 = smov 0  }
   0xa   :  { %s1930_s26 = smov 0   ;;  %s1932_s27 = smov 0  }
   0xb LB: > { %2338 = sst [smem:[#allocation18_spill]] %s1854_s26  ;;  %s1947_s28 = sadd.s32 4294967295, %s1858_s27   ;;  %s1858_s27 = sphi %s1932_s27, %s2357_s27   ;;  %s1854_s26 = sphi %s1930_s26, %s2359_s26   ;;  %s1850_s25 = sphi %s1928_s25, %s2361_s25   ;;  %s1846_s24 = sphi %s1926_s24, %s2360_s24  }
   0xc   : > { %s2332_s29 = sadd.s32 4294967294, %s1858_s27   ;;  %p50_p0 = scmp.ne.s32.totalorder %s1850_s25, %s1846_s24 }
   0xd   : > { %p2329_p1 = scmp.eq.s32.totalorder %s1947_s28, 0  ;;  %p169_p3 = scmp.eq.s32.totalorder %s2332_s29, 1 }
   0xe   : > { %p1427_p5 = scmp.ge.s32.totalorder %s1858_s27, 1  ;;  %p228_p7 = scmp.lt.s32.totalorder %s1858_s27, 3 }
   0xf   : > { %p1958_p4 = por %p2329_p1, %p50_p0  ;;  %p1963_p6 = por %p169_p3, %p50_p0 }
  0x10   : > { %p1968_p8 = pnand %p1427_p5, %p228_p7  ;;  %s1860_s10 = smov [#allocation8]  }
  0x11   : > { %s2339_s30 = scalar_select %p1958_p4, 1, 0 }
  0x12   : > { %s2340_s8 = scalar_select %p1963_p6, 1, 0 }
  0x13   : > { %s2341_s9 = scalar_select %p1968_p8, 1, 0 }
  0x14   : > { %s240_s11 = sshll.u32 %s1860_s10, 4  ;;  %p1539_p9 = pneg %p1968_p8  ;;  %s1972_s11 = int_to_ptr.vmem [resolvable:$true] %s240_s11 }
  0x15   : > { %s1984_s13 = sadd.s32 1, %s1858_s27   ;;  %s37_s14 = sadd.s32 1, %s1854_s26 }
  0x16   : > { %p1979_p11 = pnand %p1539_p9, %p2329_p1  ;;  %2343 = sst [smem:[#allocation19_spill]] %s1984_s13 }
  0x17   : > { %s34_s15 = ssub.s32 %s1858_s27, %s1984_s13  ;;  %s2344_s2 = sld [smem:[#allocation21_spill]] }
  0x18   : > { %p1638_p13 = pneg %p1979_p11 }
  0x1d   : > { %s1636_s18 = scalar_lea.hbm %s2344_s2, 256 }
  0x1e   : > { %p1637_p12 = scmp.ne.s32.totalorder %s2344_s2, %s1636_s18  ;;  %p1643_p5 = scmp.lt.u32.totalorder %s1636_s18, %s2344_s2 }
  0x20   : > { %p1639_p0 = pnand %p1638_p13, %p1637_p12 }
  0x22   : > { %p1640_p3 = pneg %p1639_p0 }
  0x24   : > { %p1645_p7 = pnand %p1643_p5, %p1640_p3 }
  0x26   : > { %1648 = shalt.err (!%p1645_p7)
}
  0x27   : > { %s1649_s23 = scalar_lea.vmem %s1972_s11, 256  ;;  %p1657_p2 = scmp.lt.s32.totalorder %s1972_s11, %s1972_s11 }
  0x28   : > { %p1650_p9 = scmp.ne.s32.totalorder %s1972_s11, %s1649_s23  ;;  %p1658_p6 = scmp.lt.s32.totalorder %s1649_s23, %s1649_s23 }
  0x2a   : > { %p1652_p10 = pnand %p1650_p9, %p1638_p13  ;;  %p1659_p4 = por %p1658_p6, %p1657_p2 }
  0x2c   : > { %p1653_p1 = pneg %p1652_p10 }
  0x2e   : > { %p1660_p8 = pnand %p1659_p4, %p1653_p1 }
  0x30   : > { %1663 = shalt.err (!%p1660_p8)
}
  0x31   : > { %s1861_s10 = smov 128   ;;  %s1862_s16 = smov 8  }
  0x32   : > { %1542 = dma.hbm_to_vmem [thread:$0]  (!%p1979_p11), %s2344_s2, 256, %s1972_s11, [#allocation7], %s1861_s10, %s1861_s10, %s1862_s16  }
  0x33   : > { %p35_p2 = scmp.eq.s32.totalorder %s34_s15, 0  ;;  %p44_p1 = scmp.ne.s32.totalorder %s1854_s26, %s1850_s25 }
  0x34   : > { %p45_p4 = scmp.eq.s32.totalorder %s1858_s27, 0  ;;  %p1561_p6 = scmp.lt.s32.totalorder %s1858_s27, 2 }
  0x35   : > { %s2015_s19 = scalar_select %p35_p2, %s1854_s26, %s37_s14  }
  0x36   : > { %p46_p8 = por %p45_p4, %p44_p1  ;;  %p2346_p10 = scmp.eq.s32.totalorder %s1947_s28, 1 }
  0x37   : > { %2345 = sst [smem:[#allocation20_spill]] %s2015_s19  ;;  %s260_s21 = sand.u32 1, %s1854_s26  }
  0x38   : > { %p2019_p12 = por %p2346_p10, %p44_p1  ;;  %s1431_s22 = sshll.u32 %s1858_s27, 6 }
  0x39   : > { %s2025_s23 = sshll.u32 %s260_s21, 2  ;;  %s2030_s11 = scalar_lea.hbm %s2321_s0, %s1431_s22 }
  0x3a   : > { %s2347_s20 = scalar_select %p2019_p12, 1, 0 }
  0x3b   : > { %s264_s14 = scalar_lea.vmem [#allocation3], %s2025_s23  ;;  %p2033_p11 = pnand %p1561_p6, %p46_p8 }
  0x3c   : > { %s271_s15 = sshll.u32 %s264_s14, 4  ;;  %s2042_s29 = scalar_lea.hbm %s2322_s1, %s1431_s22  ;;  %s2037_s15 = int_to_ptr.vmem [resolvable:$true] %s271_s15 }
  0x3d   : > { %s261_s18 = scalar_lea.sflag [#allocation4], %s260_s21  ;;  %s1664_s12 = scalar_lea.hbm %s2030_s11, 64 }
  0x3e   : > { %p1665_p13 = scmp.ne.s32.totalorder %s2030_s11, %s1664_s12  ;;  %p1666_p0 = pneg %p2033_p11 }
  0x3f   : > { %s1669_s19 = scalar_lea.hbm %s2321_s0, 128  ;;  %p1670_p7 = scmp.lt.u32.totalorder %s2030_s11, %s2321_s0 }
  0x40   : > { %p1667_p3 = pnand %p1666_p0, %p1665_p13  ;;  %p1671_p9 = scmp.lt.u32.totalorder %s1669_s19, %s1664_s12 }
  0x41   : > { %p1673_p1 = scmp.lt.u32.totalorder %s1664_s12, %s2030_s11 }
  0x42   : > { %p1668_p5 = pneg %p1667_p3  ;;  %p1672_p2 = por %p1671_p9, %p1670_p7 }
  0x44   : > { %p1674_p4 = por %p1673_p1, %p1672_p2 }
  0x46   : > { %p1675_p6 = pnand %p1674_p4, %p1668_p5 }
  0x48   : > { %1678 = shalt.err (!%p1675_p6)
}
  0x49   : > { %s1679_s21 = scalar_lea.vmem %s2037_s15, 64  ;;  %s1863_s2 = smov [#allocation3]  }
  0x4a   : > { %p1680_p8 = scmp.ne.s32.totalorder %s2037_s15, %s1679_s21  ;;  %s1684_s22 = sshll.u32 %s1863_s2, 4  ;;  %s1685_s22 = int_to_ptr.vmem [resolvable:$false] %s1684_s22 }
  0x4b   : > { %s1686_s26 = scalar_lea.vmem %s1685_s22, 128  ;;  %p1687_p3 = scmp.lt.s32.totalorder %s2037_s15, %s1685_s22 }
  0x4c   : > { %p1682_p10 = pnand %p1680_p8, %p1666_p0  ;;  %p1688_p7 = scmp.lt.s32.totalorder %s1686_s26, %s1679_s21 }
  0x4e   : > { %p1683_p13 = pneg %p1682_p10  ;;  %p1689_p9 = por %p1688_p7, %p1687_p3 }
  0x50   : > { %p1690_p2 = pnand %p1689_p9, %p1683_p13 }
  0x52   : > { %1693 = shalt.err (!%p1690_p2)
}
  0x53   : > { %1546 = dma.hbm_to_vmem [thread:$0]  (!%p2033_p11), %s2030_s11, 64, %s2037_s15, %s261_s18  }
  0x54   : > { %s278_s13 = sand.u32 1, %s1858_s27   ;;  %s282_s19 = scalar_lea.vmem [#allocation6], %s2025_s23 }
  0x55   : > { %s289_s16 = sshll.u32 %s282_s19, 4  ;;  %s279_s17 = scalar_lea.sflag [#allocation7], %s278_s13  ;;  %s290_s16 = int_to_ptr.vmem [resolvable:$true] %s289_s16 }
  0x56   : > { %s1694_s12 = scalar_lea.hbm %s2042_s29, 64  ;;  %s1699_s2 = scalar_lea.hbm %s2322_s1, 128 }
  0x57   : > { %p1695_p5 = scmp.ne.s32.totalorder %s2042_s29, %s1694_s12  ;;  %p1700_p6 = scmp.lt.u32.totalorder %s2042_s29, %s2322_s1 }
  0x58   : > { %p1701_p8 = scmp.lt.u32.totalorder %s1699_s2, %s1694_s12  ;;  %p1703_p13 = scmp.lt.u32.totalorder %s1694_s12, %s2042_s29 }
  0x59   : > { %p1697_p1 = pnand %p1695_p5, %p1666_p0 }
  0x5a   : > { %p1702_p10 = por %p1701_p8, %p1700_p6 }
  0x5b   : > { %p1698_p4 = pneg %p1697_p1 }
  0x5c   : > { %p1704_p3 = por %p1703_p13, %p1702_p10 }
  0x5e   : > { %p1705_p7 = pnand %p1704_p3, %p1698_p4 }
  0x60   : > { %1708 = shalt.err (!%p1705_p7)
}
  0x61   : > { %s1709_s23 = scalar_lea.vmem %s290_s16, 64  ;;  %s1864_s11 = smov [#allocation6]  }
  0x62   : > { %p1710_p9 = scmp.ne.s32.totalorder %s290_s16, %s1709_s23  ;;  %s1714_s15 = sshll.u32 %s1864_s11, 4  ;;  %s1715_s15 = int_to_ptr.vmem [resolvable:$false] %s1714_s15 }
  0x63   : > { %s1716_s18 = scalar_lea.vmem %s1715_s15, 128  ;;  %p1717_p1 = scmp.lt.s32.totalorder %s290_s16, %s1715_s15 }
  0x64   : > { %p1712_p2 = pnand %p1710_p9, %p1666_p0  ;;  %p1718_p12 = scmp.lt.s32.totalorder %s1716_s18, %s1709_s23 }
  0x66   : > { %p1713_p5 = pneg %p1712_p2  ;;  %p1719_p6 = por %p1718_p12, %p1717_p1 }
  0x68   : > { %p1720_p8 = pnand %p1719_p6, %p1713_p5 }
  0x6a   : > { %1723 = shalt.err (!%p1720_p8)
}
  0x6b   : > { %1549 = dma.hbm_to_vmem [thread:$0]  (!%p2033_p11), %s2042_s29, 64, %s290_s16, %s279_s17  }
  0x6c   : > { %p2349_p4 = scmp.ne.s32.totalorder %s2341_s9, 0 }
  0x6d   : > { %s2093_s13 = sand.u32 (!%p2349_p4), 1, %s1850_s25   ;;  %p2350_p0 = scmp.ne.s32.totalorder (!%p2349_p4), %s2339_s30, 0 }
  0x6e   : > { %298 = sbr.rel (%p2349_p4) target bundleno = 1446 (0x5a6), region = 40  ;;  %s1435_s19 = sshll.u32 (!%p2349_p4), %s2093_s13, 2 }
  0x6f   : > { %s301_s12 = scalar_lea.sflag (!%p2349_p4), [#allocation4], %s2093_s13  ;;  %s304_s14 = scalar_lea.vmem (!%p2349_p4), [#allocation3], %s1435_s19 }
  0x75   : > { %1825 = dma.done.wait (%p2350_p0), %s301_s12, 64  }
  0x76   : > { %1827 = vsyncadd (%p2350_p0), %s301_s12, 4294967232  ;;  %s309_s10 = sand.u32 1, %s1947_s28   ;;  %s2104_s29 = scalar_lea.vmem [#allocation6], %s1435_s19 }
  0x77   : > { %s310_s9 = scalar_lea.sflag [#allocation7], %s309_s10 }
  0x78   : > { %1829 = dma.done.wait (%p2350_p0), %s310_s9, 64  }
  0x79   : > { %1831 = vsyncadd (%p2350_p0), %s310_s9, 4294967232  ;;  %p2351_p12 = scmp.eq.s32.totalorder %s1947_s28, 0 }
  0x7b   : > { %1833 = dma.done.wait (%p2351_p12), [#allocation7], 256   ;;  %p2352_p11 = pmov %p2351_p12 }
  0x7c   : > { %v1865_v0 = vmov 0   ;;  %v1617_v1 = vld [vmem:[#allocation8 + $0x4] ss:$8 sps:$4 sm:$0xff]   ;;  %v1619_v2 = vld [vmem:[#allocation8] ss:$8 sps:$4 sm:$0xff]   ;;  %vm388_vm0 = vcmask 130048   ;;  %v368_v5 = vlaneseq }
  0x7d   : > { %1835 = vsyncadd (%p2352_p11), [#allocation7], 4294967040  ;;  %424 = vmatprep.mubr.bf16.mxu0 %v1865_v0  ;;  %392 = vmatprep.subr.bf16.mxu0 %v1617_v1  ;;  %v362_v3 = vld [vmem:[%s304_s14] sm:$0xf]  ;;  %v1866_v4 = vmov 0.0   ;;  %vm1867_vm1 = vmmov 0  }
  0x7e   : > { %393 = vmatpush1.bf16.msra.mxu0 %v1619_v2  ;;  %1480 = vmatprep.subr.mxu1 %v1866_v4  ;;  %v2116_v6 = vshrl.u32 %v368_v5, 7  ;;  %v2126_v8 = vld [vmem:[%s2324_s3] sm:$0x3]  ;;  %s1868_s17 = smov 120   ;;  %s1869_s21 = smov 96   ;;  %vm436_vm2 = vcmask 64512  }
  0x7f   : > { %1490 = vmatprep.subr.mxu0 %v1866_v4  ;;  %1482 = vmatprep.mubr.msk.f32.mxu1 %vm1867_vm1, %v1866_v4  ;;  %s1870_s2 = smov 80   ;;  %s1871_s22 = smov 88   ;;  %v363_v2 = vld [vmem:[%s2104_s29] sm:$0xf]  ;;  %vm770_vm3 = vcmask 130112   ;;  %vm942_vm4 = vcmask 195712  }
  0x80   : > { %v370_v7 = vsub.s32 0, %v2116_v6  ;;  %s1872_s26 = smov 72   ;;  %s1873_s23 = smov 112   ;;  %vm1114_vm5 = vcmask 261312   ;;  %vm1203_vm6 = vcmask 261120  }
  0x81   : > { %1441 = vmatmul.mubr.msk.bf16.vlgmr.msra.gmra.mrb[0].mxu0 %vm388_vm0, %v362_v3  ;;  %s1874_s11 = smov 104   ;;  %s1875_s15 = smov 56  }
  0x82   : > { %1492 = vmatprep.mubr.msk.f32.mxu0 %vm1867_vm1, %v1866_v4  ;;  %v371_v9 = vrot.slane %v2126_v8, %v370_v7  ;;  %s1876_s18 = smov 64   ;;  %s1877_s19 = smov 48   ;;  %v1116_v7 = vunpack.c.l.bf16 %v363_v2 }
  0x83   : > { %s1878_s12 = smov 32   ;;  %s1879_s14 = smov 40  }
  0x84   : > { %s1880_s9 = smov 8   ;;  %s1881_s16 = smov 16  }
  0x85   : > { %p2353_p13 = scmp.ne.s32.totalorder %s2347_s20, 0 }
 0x154   : > { %v426_v10 = vpop.f32.mrb[0].mxu0 }
 0x155   : > { %v2129_v11 = vadd.f32 %v426_v10, %v371_v9  ;;  %v2131_v12 = vpop.f32.mrb[1].mxu0 }
 0x156   : > { %v430_v13 = vpop.f32.mrb[2].mxu0 }
 0x157   : > { %v431_v14 = vpop.f32.mrb[3].mxu0  ;;  %600 = vrot.lane.b32.xlu1 %v2129_v11, %s1868_s17  ;;  %434 = vrot.lane.b32.xlu0 %v2129_v11, %s1869_s21  ;;  %s1882_s17 = smov 24   ;;  %s1438_s21 = sshll.u32 %s2093_s13, 3 }
 0x15b   : > { %774 = vrot.lane.b32.xlu1 %v2129_v11, %s1870_s2  ;;  %602 = vrot.lane.b32.xlu0 %v2129_v11, %s1871_s22  ;;  %s1457_s2 = sshll.u32 %s1947_s28, 7  ;;  %s348_s22 = scalar_lea.vmem [#allocation9], %s1438_s21 }
 0x15f   : > { %946 = vrot.lane.b32.xlu1 %v2129_v11, %s1872_s26  ;;  %772 = vrot.lane.b32.xlu0 %v2129_v11, %s1873_s23  ;;  %s1245_s26 = sshll.u32 %s348_s22, 4  ;;  %s2203_s26 = int_to_ptr.vmem [resolvable:$true] %s1245_s26 }
 0x163   : > { %944 = vrot.lane.b32.xlu0 %v2129_v11, %s1874_s11 }
 0x1c9   : > { %v601_v15 = vpop.permute.xlu1 %600  ;;  %v435_v16 = vpop.permute.xlu0 %434 }
 0x1ca   : > { %1481 = vmatpush3.xpose.msk.msra.mxu1 %vm436_vm2, %v435_v16 }
 0x1cb   : > { %1485 = vmatprep.subr.mxu1 %v1866_v4 }
 0x1cd   : > { %1483 = vmatmul.mubr.msk.f32.vlgmr.msra.gmra.mrb[0].mxu1 %vm436_vm2, %v2129_v11  ;;  %v603_v17 = vpop.permute.xlu0 %602  ;;  %v775_v18 = vpop.permute.xlu1 %774 }
 0x1ce   : > { %1491 = vmatpush3.xpose.msk.msra.mxu0 %vm436_vm2, %v603_v17  ;;  %1487 = vmatprep.mubr.msk.f32.mxu1 %vm1867_vm1, %v1866_v4 }
 0x1cf   : > { %1500 = vmatprep.subr.mxu0 %v1866_v4 }
 0x1d1   : > { %1493 = vmatmul.mubr.msk.f32.vlgmr.msra.gmra.mrb[4].mxu0 %vm436_vm2, %v601_v15  ;;  %v773_v19 = vpop.permute.xlu0 %772  ;;  %v947_v20 = vpop.permute.xlu1 %946 }
 0x1d2   : > { %1501 = vmatpush3.xpose.msk.msra.mxu0 %vm436_vm2, %v775_v18  ;;  %1502 = vmatprep.mubr.msk.f32.mxu0 %vm1867_vm1, %v1866_v4  ;;  %v374_v18 = vsub.s32 1, %v2116_v6 }
 0x1d3   : > { %1510 = vmatprep.subr.mxu0 %v1866_v4 }
 0x1d5   : > { %1503 = vmatmul.mubr.msk.f32.vlgmr.msra.gmra.mrb[6].mxu0 %vm436_vm2, %v773_v19  ;;  %v945_v21 = vpop.permute.xlu0 %944 }
 0x1d6   : > { %1511 = vmatpush3.xpose.msk.msra.mxu0 %vm436_vm2, %v947_v20  ;;  %1512 = vmatprep.mubr.msk.f32.mxu0 %vm1867_vm1, %v1866_v4 }
 0x1d7   : > { %1520 = vmatprep.subr.mxu0 %v1866_v4 }
 0x1d9   : > { %1513 = vmatmul.mubr.msk.f32.vlgmr.msra.gmra.mrb[8].mxu0 %vm436_vm2, %v945_v21  ;;  %v375_v21 = vrot.slane %v2126_v8, %v374_v18 }
 0x1da   : > { %1522 = vmatprep.mubr.msk.f32.mxu0 %vm1867_vm1, %v1866_v4 }
 0x2a0   : > { %v507_v22 = vpop.f32.mrb[0].mxu1 }
 0x2a1   : > { %v511_v23 = vmul.f32 0.35355338, %v507_v22  ;;  %v1484_v24 = vpop.f32.mrb[1].mxu1 }
 0x2a2   : > { %v429_v24 = vadd.f32 %v2131_v12, %v375_v21 }
 0x2a3   : > { %v512_v25 = vsel %vm436_vm2, %v511_v23, -inf }
 0x2a4   : > { %513 = vmax.xlane.f32.xlu1 %v512_v25  ;;  %v674_v26 = vpop.f32.mrb[4].mxu0 }
 0x2a5   : > { %v678_v27 = vmul.f32 0.35355338, %v674_v26  ;;  %v1494_v28 = vpop.f32.mrb[5].mxu0 }
 0x2a7   : > { %v679_v29 = vsel %vm436_vm2, %v678_v27, -inf }
 0x2a8   : > { %680 = vmax.xlane.f32.xlu0 %v679_v29  ;;  %v846_v30 = vpop.f32.mrb[6].mxu0 }
 0x2a9   : > { %v850_v31 = vmul.f32 0.35355338, %v846_v30  ;;  %v1504_v32 = vpop.f32.mrb[7].mxu0 }
 0x2ab   : > { %v851_v33 = vsel %vm436_vm2, %v850_v31, -inf }
 0x2ac   : > { %852 = vmax.xlane.f32.xlu0 %v851_v33  ;;  %v1018_v34 = vpop.f32.mrb[8].mxu0 }
 0x2ad   : > { %v1022_v35 = vmul.f32 0.35355338, %v1018_v34  ;;  %v1514_v36 = vpop.f32.mrb[9].mxu0 }
 0x2af   : > { %v1023_v37 = vsel %vm436_vm2, %v1022_v35, -inf }
 0x2b0   : > { %1024 = vmax.xlane.f32.xlu1 %v1023_v37 }
 0x2c1   : > { %690 = vrot.lane.b32.xlu1 %v2129_v11, %s1875_s15  ;;  %s2201_s15 = scalar_lea.hbm %s2326_s5, %s1457_s2 }
 0x331   : > { %v514_v38 = vpop.xlane.xlu1 %513 }
 0x332   : > { %v515_v39 = vsub.f32 %v511_v23, %v514_v38  ;;  %v1454_v23 = vld [vmem:[%s2325_s4] ss:$0 sm:$0xff] }
 0x334   : > { %v516_v40 = vmul.f32 1.442695, %v515_v39 }
 0x335   : > { %v681_v41 = vpop.xlane.xlu0 %680 }
 0x336   : > { %1620 = vpow2.f32 %v516_v40  ;;  %v682_v42 = vsub.f32 %v678_v27, %v681_v41 }
 0x338   : > { %v683_v43 = vmul.f32 1.442695, %v682_v42 }
 0x339   : > { %v853_v53 = vpop.xlane.xlu0 %852 }
 0x33a   : > { %1622 = vpow2.f32 %v683_v43  ;;  %v854_v54 = vsub.f32 %v850_v31, %v853_v53 }
 0x33c   : > { %v855_v55 = vmul.f32 1.442695, %v854_v54 }
 0x33d   : > { %v1025_v44 = vpop.xlane.xlu1 %1024 }
 0x33e   : > { %v1026_v45 = vsub.f32 %v1022_v35, %v1025_v44 }
 0x340   : > { %v1621_v46 = vpop.eup %1620  ;;  %v1027_v47 = vmul.f32 1.442695, %v1026_v45 }
 0x341   : > { %v518_v48 = vsel %vm436_vm2, %v1621_v46, 0.0  ;;  %v691_v58 = vpop.permute.xlu1 %690 }
 0x342   : > { %1624 = vpow2.f32 %v1027_v47  ;;  %519 = vadd.xlane.f32.xlu0 %v518_v48 }
 0x343   : > { %1626 = vpow2.f32 %v855_v55 }
 0x344   : > { %v1623_v49 = vpop.eup %1622 }
 0x345   : > { %v685_v50 = vsel %vm436_vm2, %v1623_v49, 0.0 }
 0x346   : > { %686 = vadd.xlane.f32.xlu1 %v685_v50 }
 0x34c   : > { %v1625_v51 = vpop.eup %1624 }
 0x34d   : > { %v1029_v52 = vsel %vm436_vm2, %v1625_v51, 0.0  ;;  %v1627_v56 = vpop.eup %1626 }
 0x34e   : > { %1030 = vadd.xlane.f32.xlu1 %v1029_v52  ;;  %v857_v57 = vsel %vm436_vm2, %v1627_v56, 0.0 }
 0x358   : > { %523 = vrot.lane.b32.xlu0 %v2129_v11, %s1876_s18  ;;  %s1224_s18 = scalar_lea.sflag [#allocation5], %s2093_s13 }
 0x35f   : > { %862 = vrot.lane.b32.xlu1 %v2129_v11, %s1877_s19  ;;  %s1724_s19 = scalar_lea.vmem %s2203_s26, 128 }
 0x360   : > { %p1725_p10 = scmp.ne.s32.totalorder %s2203_s26, %s1724_s19 }
 0x362   : > { %p1726_p3 = pnand %p1725_p10, %p2353_p13 }
 0x363   : > { %1124 = vrot.lane.b32.xlu1 %v2129_v11, %s1878_s12  ;;  %s1883_s12 = smov [#allocation9]  }
 0x364   : > { %p1727_p7 = pneg %p1726_p3 }
 0x377   : > { %858 = vadd.xlane.f32.xlu0 %v857_v57 }
 0x38d   : > { %1034 = vrot.lane.b32.xlu0 %v2129_v11, %s1879_s14  ;;  %s1728_s14 = sshll.u32 %s1883_s12, 4  ;;  %s1729_s14 = int_to_ptr.vmem [resolvable:$false] %s1728_s14 }
 0x38e   : > { %p1731_p9 = scmp.lt.s32.totalorder %s2203_s26, %s1729_s14 }
 0x3cf   : > { %v520_v59 = vpop.xlane.xlu0 %519 }
 0x3d0   : > { %1628 = vrcp.f32 %v520_v59 }
 0x3d3   : > { %v687_v60 = vpop.xlane.xlu1 %686  ;;  %v524_v61 = vpop.permute.xlu0 %523 }
 0x3d4   : > { %1630 = vrcp.f32 %v687_v60  ;;  %1486 = vmatpush3.msra.mxu1 %v524_v61 }
 0x3d5   : > { %1495 = vmatprep.subr.mxu1 %v1866_v4 }
 0x3da   : > { %v1629_v62 = vpop.eup %1628 }
 0x3db   : > { %v522_v63 = vmul.f32 %v1629_v62, %v1621_v46  ;;  %v1031_v0 = vpop.xlane.xlu1 %1030 }
 0x3dd   : > { %1488 = vmatmul.mubr.msk.f32.vlgmr.msra.gmra.mrb[2].mxu1 %vm436_vm2, %v522_v63 }
 0x3de   : > { %v1631_v1 = vpop.eup %1630  ;;  %1496 = vmatpush3.msra.mxu1 %v691_v58  ;;  %1497 = vmatprep.mubr.msk.f32.mxu1 %vm1867_vm1, %v1866_v4 }
 0x3df   : > { %v689_v3 = vmul.f32 %v1631_v1, %v1623_v49  ;;  %v863_v5 = vpop.permute.xlu1 %862  ;;  %1505 = vmatprep.subr.mxu1 %v1866_v4 }
 0x3e1   : > { %1498 = vmatmul.mubr.msk.f32.vlgmr.msra.gmra.mrb[4].mxu1 %vm436_vm2, %v689_v3 }
 0x3e2   : > { %1506 = vmatpush3.msra.mxu1 %v863_v5  ;;  %1507 = vmatprep.mubr.msk.f32.mxu1 %vm1867_vm1, %v1866_v4 }
 0x3e3   : > { %v1125_v9 = vpop.permute.xlu1 %1124  ;;  %1515 = vmatprep.subr.mxu1 %v1866_v4 }
 0x3e4   : > { %1521 = vmatpush3.msra.mxu0 %v1125_v9 }
 0x3e5   : > { %1523 = vmatmul.mubr.msk.f32.vlgmr.msra.gmra.mrb[10].mxu0 %vm436_vm2, %v1116_v7 }
 0x404   : > { %v859_v10 = vpop.xlane.xlu0 %858 }
 0x405   : > { %1632 = vrcp.f32 %v859_v10 }
 0x406   : > { %1634 = vrcp.f32 %v1031_v0 }
 0x408   : > { %v1035_v15 = vpop.permute.xlu0 %1034 }
 0x40f   : > { %v1633_v11 = vpop.eup %1632 }
 0x410   : > { %v861_v13 = vmul.f32 %v1633_v11, %v1627_v56  ;;  %v1635_v14 = vpop.eup %1634 }
 0x411   : > { %v1033_v16 = vmul.f32 %v1635_v14, %v1625_v51 }
 0x412   : > { %1508 = vmatmul.mubr.msk.f32.vlgmr.msra.gmra.mrb[6].mxu1 %vm436_vm2, %v861_v13 }
 0x413   : > { %1516 = vmatpush3.msra.mxu1 %v1035_v15  ;;  %1517 = vmatprep.mubr.msk.f32.mxu1 %vm1867_vm1, %v1866_v4 }
 0x416   : > { %1518 = vmatmul.mubr.msk.f32.vlgmr.msra.gmra.mrb[8].mxu1 %vm436_vm2, %v1033_v16 }
 0x4b0   : > { %v595_v17 = vpop.f32.mrb[2].mxu1 }
 0x4b1   : > { %599 = vst.msk [vmem:[#allocation2] sm:$0xff] %vm436_vm2, %v595_v17  ;;  %v1489_v19 = vpop.f32.mrb[3].mxu1 }
 0x4b4   : > { %v762_v20 = vpop.f32.mrb[4].mxu1 }
 0x4b5   : > { %767 = vrot.lane.b32.xlu0 %v762_v20, %s1880_s9  ;;  %v1499_v22 = vpop.f32.mrb[5].mxu1  ;;  %s1730_s9 = scalar_lea.vmem %s1729_s14, 256 }
 0x4b6   : > { %p1732_p2 = scmp.lt.s32.totalorder %s1730_s9, %s1724_s19 }
 0x4b8   : > { %v1196_v4 = vpop.f32.mrb[10].mxu0  ;;  %p1733_p5 = por %p1732_p2, %p1731_p9 }
 0x4b9   : > { %v1197_v25 = vadd.f32 %v1454_v23, %v1196_v4  ;;  %v1524_v26 = vpop.f32.mrb[11].mxu0 }
 0x4ba   : > { %p1734_p1 = pnand %p1733_p5, %p1727_p7 }
 0x4bb   : > { %v1200_v27 = vadd.f32 %v1197_v25, %v429_v24 }
 0x4e5   : > { %v934_v6 = vpop.f32.mrb[6].mxu1 }
 0x4e6   : > { %939 = vrot.lane.b32.xlu1 %v934_v6, %s1881_s16  ;;  %v1509_v28 = vpop.f32.mrb[7].mxu1 }
 0x4e9   : > { %v1106_v8 = vpop.f32.mrb[8].mxu1 }
 0x4ea   : > { %1111 = vrot.lane.b32.xlu0 %v1106_v8, %s1882_s17  ;;  %v1519_v29 = vpop.f32.mrb[9].mxu1 }
 0x527   : > { %v768_v30 = vpop.permute.xlu0 %767 }
 0x528   : > { %771 = vst.msk [vmem:[#allocation2] sm:$0xff] %vm770_vm3, %v768_v30 }
 0x558   : > { %v940_v31 = vpop.permute.xlu1 %939 }
 0x559   : > { %943 = vst.msk [vmem:[#allocation2] sm:$0xff] %vm942_vm4, %v940_v31 }
 0x55c   : > { %v1112_v12 = vpop.permute.xlu0 %1111 }
 0x55d   : > { %1115 = vst.msk [vmem:[#allocation2] sm:$0xff] %vm1114_vm5, %v1112_v12 }
 0x564   : > { %v1201_v32 = vld [vmem:[#allocation2] sm:$0xff] }
 0x565   : > { %v1202_v33 = vadd.f32 %v1201_v32, %v1200_v27 }
 0x567   : > { %v1205_v34 = vsel %vm1203_vm6, %v1202_v33, 0.0  ;;  %1204 = vst.msk [vmem:[%s348_s22] sm:$0xff] %vm1203_vm6, %v1202_v33  ;;  %v1214_v35 = vmul.f32 %v1202_v33, %v1202_v33 }
 0x568   : > { %v1206_v36 = vrot.slane %v1205_v34, 4 }
 0x569   : > { %1737 = shalt.err (!%p1734_p1)
}
 0x56a   : > { %s1738_s29 = scalar_lea.hbm %s2201_s15, 128  ;;  %s1742_s17 = scalar_lea.hbm %s2326_s5, 256 }
 0x56b   : > { %p1739_p6 = scmp.ne.s32.totalorder %s2201_s15, %s1738_s29  ;;  %p1743_p0 = scmp.lt.u32.totalorder %s2201_s15, %s2326_s5 }
 0x56c   : > { %p1744_p12 = scmp.lt.u32.totalorder %s1742_s17, %s1738_s29  ;;  %p1746_p10 = scmp.lt.u32.totalorder %s1738_s29, %s2201_s15 }
 0x56d   : > { %p1740_p8 = pnand %p1739_p6, %p2353_p13 }
 0x56e   : > { %p1745_p11 = por %p1744_p12, %p1743_p0 }
 0x56f   : > { %p1741_p4 = pneg %p1740_p8 }
 0x570   : > { %p1747_p3 = por %p1746_p10, %p1745_p11 }
 0x572   : > { %p1748_p7 = pnand %p1747_p3, %p1741_p4 }
 0x574   : > { %1751 = shalt.err (!%p1748_p7)
}
 0x575   : > { %1533 = dma.vmem_to_hbm [thread:$0]  (%p2353_p13), %s2203_s26, 128, %s2201_s15, %s1224_s18   ;;  %v1215_v37 = vsel %vm1203_vm6, %v1214_v35, 0.0  ;;  %v1207_v38 = vadd.f32 %v1206_v36, %v1205_v34  ;;  %vm1212_vm7 = vcmask 253952  }
 0x576   : > { %v1216_v39 = vrot.slane %v1215_v37, 4  ;;  %s1458_s22 = sshll.u32 %s1947_s28, 4  ;;  %s354_s23 = scalar_lea.vmem [#allocation10], %s2093_s13 }
 0x577   : > { %v1208_v40 = vrot.slane %v1207_v38, 2  ;;  %s1258_s11 = sshll.u32 %s354_s23, 4  ;;  %s360_s19 = scalar_lea.vmem [#allocation12], %s2093_s13  ;;  %s2240_s11 = int_to_ptr.vmem [resolvable:$true] %s1258_s11 }
 0x578   : > { %v1217_v41 = vadd.f32 %v1216_v39, %v1215_v37  ;;  %s1271_s12 = sshll.u32 %s360_s19, 4  ;;  %s2238_s18 = scalar_lea.hbm %s2327_s6, %s1458_s22  ;;  %s2248_s12 = int_to_ptr.vmem [resolvable:$true] %s1271_s12 }
 0x579   : > { %v1209_v42 = vadd.f32 %v1208_v40, %v1207_v38  ;;  %s2246_s29 = scalar_lea.hbm %s2328_s7, %s1458_s22  ;;  %s2252_s30 = scalar_lea.sflag [#allocation11], %s309_s10 }
 0x57a   : > { %v1218_v43 = vrot.slane %v1217_v41, 2  ;;  %s1752_s16 = scalar_lea.vmem %s2240_s11, 16  ;;  %s1884_s17 = smov [#allocation10]  }
 0x57b   : > { %v1210_v44 = vrot.slane %v1209_v42, 1  ;;  %p1753_p9 = scmp.ne.s32.totalorder %s2240_s11, %s1752_s16  ;;  %s1756_s21 = sshll.u32 %s1884_s17, 4  ;;  %s1757_s21 = int_to_ptr.vmem [resolvable:$false] %s1756_s21 }
 0x57c   : > { %v1219_v45 = vadd.f32 %v1218_v43, %v1217_v41  ;;  %s1758_s2 = scalar_lea.vmem %s1757_s21, 32  ;;  %p1759_p1 = scmp.lt.s32.totalorder %s2240_s11, %s1757_s21 }
 0x57d   : > { %v1211_v46 = vadd.f32 %v1210_v44, %v1209_v42  ;;  %p1754_p2 = pnand %p1753_p9, %p2353_p13  ;;  %p1760_p6 = scmp.lt.s32.totalorder %s1758_s2, %s1752_s16 }
 0x57e   : > { %v1220_v47 = vrot.slane %v1219_v45, 1 }
 0x57f   : > { %1213 = vst.msk [vmem:[%s354_s23] sm:$0x1] %vm1212_vm7, %v1211_v46  ;;  %p1755_p5 = pneg %p1754_p2  ;;  %p1761_p8 = por %p1760_p6, %p1759_p1 }
 0x580   : > { %v1221_v48 = vadd.f32 %v1220_v47, %v1219_v45 }
 0x581   : > { %p1762_p4 = pnand %p1761_p8, %p1755_p5 }
 0x583   : > { %1765 = shalt.err (!%p1762_p4)
}
 0x584   : > { %s1766_s28 = scalar_lea.hbm %s2238_s18, 16  ;;  %s1770_s23 = scalar_lea.hbm %s2327_s6, 32 }
 0x585   : > { %p1767_p0 = scmp.ne.s32.totalorder %s2238_s18, %s1766_s28  ;;  %p1771_p10 = scmp.lt.u32.totalorder %s2238_s18, %s2327_s6 }
 0x586   : > { %p1772_p3 = scmp.lt.u32.totalorder %s1770_s23, %s1766_s28  ;;  %p1774_p9 = scmp.lt.u32.totalorder %s1766_s28, %s2238_s18 }
 0x587   : > { %p1768_p12 = pnand %p1767_p0, %p2353_p13 }
 0x588   : > { %p1773_p7 = por %p1772_p3, %p1771_p10 }
 0x589   : > { %p1769_p11 = pneg %p1768_p12 }
 0x58a   : > { %p1775_p2 = por %p1774_p9, %p1773_p7 }
 0x58c   : > { %p1776_p5 = pnand %p1775_p2, %p1769_p11 }
 0x58e   : > { %1779 = shalt.err (!%p1776_p5)
}
 0x58f   : > { %1534 = dma.vmem_to_hbm [thread:$0]  (%p2353_p13), %s2240_s11, 16, %s2238_s18, %s2252_s30   ;;  %1222 = vst.msk [vmem:[%s360_s19] sm:$0x1] %vm1212_vm7, %v1221_v48 }
 0x590   : > { %s1780_s14 = scalar_lea.vmem %s2248_s12, 16  ;;  %s1885_s9 = smov [#allocation12]  }
 0x591   : > { %p1781_p1 = scmp.ne.s32.totalorder %s2248_s12, %s1780_s14  ;;  %s1784_s16 = sshll.u32 %s1885_s9, 4  ;;  %s1785_s16 = int_to_ptr.vmem [resolvable:$false] %s1784_s16 }
 0x592   : > { %s1786_s17 = scalar_lea.vmem %s1785_s16, 32  ;;  %p1787_p4 = scmp.lt.s32.totalorder %s2248_s12, %s1785_s16 }
 0x593   : > { %p1782_p6 = pnand %p1781_p1, %p2353_p13  ;;  %p1788_p0 = scmp.lt.s32.totalorder %s1786_s17, %s1780_s14 }
 0x595   : > { %p1783_p8 = pneg %p1782_p6  ;;  %p1789_p12 = por %p1788_p0, %p1787_p4 }
 0x597   : > { %p1790_p11 = pnand %p1789_p12, %p1783_p8 }
 0x599   : > { %1793 = shalt.err (!%p1790_p11)
}
 0x59a   : > { %s1794_s13 = scalar_lea.hbm %s2246_s29, 16  ;;  %s1798_s18 = scalar_lea.hbm %s2328_s7, 32 }
 0x59b   : > { %p1795_p10 = scmp.ne.s32.totalorder %s2246_s29, %s1794_s13  ;;  %p1799_p9 = scmp.lt.u32.totalorder %s2246_s29, %s2328_s7 }
 0x59c   : > { %p1800_p2 = scmp.lt.u32.totalorder %s1798_s18, %s1794_s13  ;;  %p1802_p1 = scmp.lt.u32.totalorder %s1794_s13, %s2246_s29 }
 0x59d   : > { %p1796_p3 = pnand %p1795_p10, %p2353_p13 }
 0x59e   : > { %p1801_p5 = por %p1800_p2, %p1799_p9 }
 0x59f   : > { %p1797_p7 = pneg %p1796_p3 }
 0x5a0   : > { %p1803_p6 = por %p1802_p1, %p1801_p5 }
 0x5a2   : > { %p1804_p8 = pnand %p1803_p6, %p1797_p7 }
 0x5a4   : > { %1807 = shalt.err (!%p1804_p8)
}
 0x5a5   : > { %1535 = dma.vmem_to_hbm [thread:$0]  (%p2353_p13), %s2248_s12, 16, %s2246_s29, %s2252_s30  }
 0x5a6 PF: > { %s1283_s28 = sand.u32 1, %s1846_s24   ;;  %p2354_p4 = scmp.ne.s32.totalorder %s2340_s8, 0 }
 0x5a7   : > { %p2355_p0 = scmp.ge.s32.totalorder %s1858_s27, 2  ;;  %s1284_s10 = scalar_lea.sflag [#allocation5], %s1283_s28 }
 0x5a9   : > { %p1551_p12 = pnand %p2355_p0, %p2354_p4 }
 0x5ab   : > { %1837 = dma.done.wait (!%p1551_p12), %s1284_s10, 128  }
 0x5ac   : > { %1839 = vsyncadd (!%p1551_p12), %s1284_s10, 4294967168  ;;  %s2356_s22 = sadd.s32 4294967294, %s1858_s27  }
 0x5ad   : > { %s1292_s23 = sand.u32 1, %s2356_s22  }
 0x5ae   : > { %s1293_s26 = scalar_lea.sflag [#allocation11], %s1292_s23 }
 0x5af   : > { %1841 = dma.done.wait (!%p1551_p12), %s1293_s26, 32  }
 0x5b0   : > { %1843 = vsyncadd (!%p1551_p12), %s1293_s26, 4294967264  ;;  %s2357_s27 = sld [smem:[#allocation19_spill]]  ;;  %s2358_s20 = sld [smem:[#allocation18_spill]] }
 0x5b1   : > { %s2359_s26 = sld [smem:[#allocation20_spill]]  ;;  %s2360_s24 = smov %s1850_s25 }
 0x5b6   : > { %p27_p13 = scmp.ge.s32.totalorder %s2357_s27, 4   ;;  %s2361_s25 = smov %s2358_s20 }
 0x5b8   :  { %29 = sbr.rel (!%p27_p13) target bundleno = 11 (0xb), region = 134 }
 0x5bf   :  { %1305 = vsyncpa [#allocation4], 1 }
 0x5c0   :  { %1307 = vsyncpa [#allocation4 + $0x1], 1 }
 0x5c1   :  { %1308 = vsyncpa [#allocation7], 1 }
 0x5c2   :  { %1310 = vsyncpa [#allocation7 + $0x1], 1 }
 0x5c3   :  { %1311 = vsyncpa [#allocation5], 1 }
 0x5c4   :  { %1313 = vsyncpa [#allocation5 + $0x1], 1 }
 0x5c5   :  { %1314 = vsyncpa [#allocation11], 1 }
 0x5c6   :  { %1316 = vsyncpa [#allocation11 + $0x1], 1 }

</bundles_post_ra>
